<compile_context>
chip_gen: v7x
topology: tpu7x:2x2x1
jax: 0.10.0
libtpu: 0.0.40
codegen_flags: <defaults>
</compile_context>

<pallas_src>
import jax
import jax.numpy as jnp
from jax.experimental import pallas as pl
from jax.experimental.pallas import tpu as pltpu

HIDDEN_DIM = 64
N = 16
K = 16
INPUT_DIM = K * N  # 256

DEFAULT_BLOCK_B = 512  # rows per batch tile (multiple of 8 and of 128)


def _mlp_kernel(x_ref, w1_ref, b1_ref, w2_ref, o_ref):
    # hidden = relu(x @ W1 + b1): MXU matmul, VPU bias-add + max.
    h = jnp.dot(x_ref[...], w1_ref[...], preferred_element_type=jnp.float32)
    h = jnp.maximum(h + b1_ref[...], 0.0)                     # (tb, H)
    # Output layer (out_features == 1): VPU multiply + XLU lane reduction
    # instead of a second, dependent N=1 MXU matmul.
    o = jnp.sum(h * w2_ref[...], axis=-1, keepdims=True)      # (tb, 1)
    o_ref[...] = o.astype(o_ref.dtype)


def _round_up(x, m):
    return (x + m - 1) // m * m


def time_lagged_nonlinear_output(x, w1, b1, w2, b2, *, block_b=None):
    """Forward pass of TimeLaggedNonLinearOutputModel.

    x:  (B, input_dim) f32
    w1: (input_dim, hidden) f32  (transposed vs. PyTorch's (hidden, input_dim))
    b1: (hidden,) f32
    w2: (hidden, 1) f32          (transposed vs. PyTorch's (1, hidden))
    b2: (1,) f32
    returns (B, 1) f32
    """
    B, D = x.shape
    H = w1.shape[1]

    if block_b is None:
        block_b = DEFAULT_BLOCK_B
    # Never larger than needed; keep the tile a multiple of 8 sublanes.
    block_b = min(block_b, _round_up(B, 8))
    num_blocks = pl.cdiv(B, block_b)

    b1_row = b1.reshape(1, H)
    w2_row = w2.reshape(1, H)  # row layout for the VPU broadcast-multiply

    out = pl.pallas_call(
        _mlp_kernel,
        out_shape=jax.ShapeDtypeStruct((B, 1), jnp.float32),
        grid_spec=pltpu.PrefetchScalarGridSpec(
            num_scalar_prefetch=0,
            grid=(num_blocks,),
            in_specs=[
                pl.BlockSpec((block_b, D), lambda i: (i, 0)),  # x tile (streamed)
                pl.BlockSpec((D, H), lambda i: (0, 0)),        # W1 (VMEM-resident)
                pl.BlockSpec((1, H), lambda i: (0, 0)),        # b1
                pl.BlockSpec((1, H), lambda i: (0, 0)),        # w2 row
            ],
            out_specs=pl.BlockSpec((block_b, 1), lambda i: (i, 0)),
        ),
        compiler_params=pltpu.CompilerParams(
            dimension_semantics=("parallel",),      # batch tiles are independent
            vmem_limit_bytes=32 * 1024 * 1024,      # ample headroom; safe on v5e/v6e/v7x
        ),
    )(x, w1, b1_row, w2_row)

    # Fold the scalar output bias in the wrapper (negligible (B, 1) add).
    return out + b2.reshape(1, 1)


def _init_params(key, input_dim, hidden_dim):
    """Deterministic init mimicking PyTorch nn.Linear default (uniform +-1/sqrt(fan_in))."""
    k1, k2, k3, k4 = jax.random.split(key, 4)
    bound1 = 1.0 / jnp.sqrt(input_dim)
    bound2 = 1.0 / jnp.sqrt(hidden_dim)
    # Stored already transposed: (in_features, out_features)
    w1 = jax.random.uniform(k1, (input_dim, hidden_dim), jnp.float32, -bound1, bound1)
    b1 = jax.random.uniform(k2, (hidden_dim,), jnp.float32, -bound1, bound1)
    w2 = jax.random.uniform(k3, (hidden_dim, 1), jnp.float32, -bound2, bound2)
    b2 = jax.random.uniform(k4, (1,), jnp.float32, -bound2, bound2)
    return w1, b1, w2, b2


if __name__ == "__main__":
    key = jax.random.PRNGKey(0)
    kx, kx2, kp = jax.random.split(key, 3)

    w1, b1, w2, b2 = _init_params(kp, INPUT_DIM, HIDDEN_DIM)

    def ref_fwd(xv):
        # Pure-JAX reference (same math as the PyTorch forward).
        return jnp.maximum(xv @ w1 + b1, 0.0) @ w2 + b2

    # Small-shape demo (single batch tile).
    batch = 8
    x = jax.random.normal(kx, (batch, INPUT_DIM), dtype=jnp.float32)
    out = jax.block_until_ready(time_lagged_nonlinear_output(x, w1, b1, w2, b2))
    assert out.shape == (batch, 1), out.shape
    assert jnp.allclose(out, ref_fwd(x), atol=3e-5, rtol=1e-5), "mismatch vs reference (small)"

    # Tiled / pipelined path: 2 grid steps with a ragged last tile (520 = 512 + 8).
    batch2 = 520
    x2 = jax.random.normal(kx2, (batch2, INPUT_DIM), dtype=jnp.float32)
    out2 = jax.block_until_ready(time_lagged_nonlinear_output(x2, w1, b1, w2, b2))
    assert out2.shape == (batch2, 1), out2.shape
    assert jnp.allclose(out2, ref_fwd(x2), atol=3e-5, rtol=1e-5), "mismatch vs reference (tiled)"

    print("KERNEL_OK")
</pallas_src>

<mosaic_0001>
module attributes {stable_mosaic.version = 11 : i64} {
  func.func @_mlp_kernel(%arg0: i32, %arg1: memref<8x256xf32, #tpu.memory_space<vmem>>, %arg2: memref<256x64xf32, #tpu.memory_space<vmem>>, %arg3: memref<1x64xf32, #tpu.memory_space<vmem>>, %arg4: memref<1x64xf32, #tpu.memory_space<vmem>>, %arg5: memref<8x1xf32, #tpu.memory_space<vmem>>) attributes {dimension_semantics = [#tpu.dimension_semantics<parallel>], iteration_bounds = array<i64: 1>, scalar_prefetch = 0 : i64, scratch_operands = 0 : i64, tpu.core_type = #tpu.core_type<tc>, window_params = [{transform_indices = @transform_0, window_bounds = array<i64: 8, 256>}, {pipeline_mode = #tpu.pipeline_mode<synchronous>, transform_indices = @transform_1, window_bounds = array<i64: 256, 64>}, {pipeline_mode = #tpu.pipeline_mode<synchronous>, transform_indices = @transform_2, window_bounds = array<i64: 1, 64>}, {pipeline_mode = #tpu.pipeline_mode<synchronous>, transform_indices = @transform_3, window_bounds = array<i64: 1, 64>}, {transform_indices = @transform_4, window_bounds = array<i64: 8, 1>}]} {
    %c0 = arith.constant 0 : index
    %c0_0 = arith.constant 0 : index
    %0 = vector.load %arg1[%c0, %c0_0] : memref<8x256xf32, #tpu.memory_space<vmem>>, vector<8x256xf32>
    %c0_1 = arith.constant 0 : index
    %c0_2 = arith.constant 0 : index
    %1 = vector.load %arg2[%c0_1, %c0_2] : memref<256x64xf32, #tpu.memory_space<vmem>>, vector<256x64xf32>
    %cst = arith.constant dense<0.000000e+00> : vector<8x64xf32>
    %2 = tpu.matmul %0, %1, %cst {dimension_numbers = #tpu.dot_dimension_numbers<[1], [0], [0], [1], [0, 0, 1, 1], [], []>} : vector<8x256xf32>, vector<256x64xf32>, vector<8x64xf32> -> vector<8x64xf32>
    %c0_3 = arith.constant 0 : index
    %c0_4 = arith.constant 0 : index
    %3 = vector.load %arg3[%c0_3, %c0_4] : memref<1x64xf32, #tpu.memory_space<vmem>>, vector<1x64xf32>
    %4 = vector.broadcast %3 : vector<1x64xf32> to vector<8x64xf32>
    %5 = arith.addf %2, %4 : vector<8x64xf32>
    %cst_5 = arith.constant 0.000000e+00 : f32
    %6 = vector.broadcast %cst_5 : f32 to vector<8x64xf32>
    %7 = arith.maximumf %5, %6 : vector<8x64xf32>
    %c0_6 = arith.constant 0 : index
    %c0_7 = arith.constant 0 : index
    %8 = vector.load %arg4[%c0_6, %c0_7] : memref<1x64xf32, #tpu.memory_space<vmem>>, vector<1x64xf32>
    %9 = vector.broadcast %8 : vector<1x64xf32> to vector<8x64xf32>
    %10 = arith.mulf %7, %9 : vector<8x64xf32>
    %cst_8 = arith.constant dense<0.000000e+00> : vector<8xf32>
    %11 = vector.multi_reduction <add>, %10, %cst_8 [1] : vector<8x64xf32> to vector<8xf32>
    %12 = vector.shape_cast %11 : vector<8xf32> to vector<8x1xf32>
    %c0_9 = arith.constant 0 : index
    %c0_10 = arith.constant 0 : index
    %13 = vector.load %arg5[%c0_9, %c0_10] : memref<8x1xf32, #tpu.memory_space<vmem>>, vector<8x1xf32>
    tpu.vector_store %arg5[%c0_9, %c0_10], %12 {strides = array<i32>} : memref<8x1xf32, #tpu.memory_space<vmem>>, vector<8x1xf32>,
    return
  }
  func.func @transform_0(%arg0: i32) -> (i32, i32) {
    %c0_i32 = arith.constant 0 : i32
    %c0_i32_0 = arith.constant 0 : i32
    return %arg0, %c0_i32 : i32, i32
  }
  func.func @transform_1(%arg0: i32) -> (i32, i32) {
    %c0_i32 = arith.constant 0 : i32
    %c0_i32_0 = arith.constant 0 : i32
    %c0_i32_1 = arith.constant 0 : i32
    return %c0_i32, %c0_i32_0 : i32, i32
  }
  func.func @transform_2(%arg0: i32) -> (i32, i32) {
    %c0_i32 = arith.constant 0 : i32
    %c0_i32_0 = arith.constant 0 : i32
    %c0_i32_1 = arith.constant 0 : i32
    return %c0_i32, %c0_i32_0 : i32, i32
  }
  func.func @transform_3(%arg0: i32) -> (i32, i32) {
    %c0_i32 = arith.constant 0 : i32
    %c0_i32_0 = arith.constant 0 : i32
    %c0_i32_1 = arith.constant 0 : i32
    return %c0_i32, %c0_i32_0 : i32, i32
  }
  func.func @transform_4(%arg0: i32) -> (i32, i32) {
    %c0_i32 = arith.constant 0 : i32
    %c0_i32_0 = arith.constant 0 : i32
    return %arg0, %c0_i32 : i32, i32
  }
}

</mosaic_0001>

<bundles_post_ra>
// kernel: tpu_custom_call.1
= control target key start
LH: loop header
LB: loop body
LE: loop exit
PB: predicated region body
PF: predicated region fallthrough
CT: control target
= control target key end

     0   :  { %vm137_vm0 = vcmask 523264   ;;  %vm141_vm1 = vcmask 7168   ;;  %s352_s1 = inlined_call_operand.vmem [shape: f32[256,64], index: 1, kind: input, shape index: {}]   ;;  %s353_s0 = inlined_call_operand.vmem [shape: f32[8,256], index: 0, kind: input, shape index: {}]   ;;  %s354_s2 = inlined_call_operand.vmem [shape: f32[1,64], index: 2, kind: input, shape index: {}]   ;;  %s355_s3 = inlined_call_operand.vmem [shape: f32[1,64], index: 3, kind: input, shape index: {}]   ;;  %s356_s4 = inlined_call_operand.vmem [shape: f32[8,1], index: 4, kind: output, shape index: {}]  }
   0x1   :  { %v35_v0 = vld [vmem:[%s352_s1 + $0x80] sm:$0xff]  ;;  %v36_v1 = vld [vmem:[%s352_s1 + $0x88] sm:$0xff]  ;;  %v37_v5 = vld [vmem:[%s352_s1 + $0x90] sm:$0xff] }
   0x2   :  { %v19_v2 = vld [vmem:[%s352_s1] sm:$0xff]  ;;  %v184_v3 = vpack.c.bf16 %v36_v1, %v35_v0  ;;  %v20_v4 = vld [vmem:[%s352_s1 + $0x8] sm:$0xff]  ;;  %v38_v6 = vld [vmem:[%s352_s1 + $0x98] sm:$0xff] }
   0x3   :  { %v186_v7 = vpack.c.bf16 %v20_v4, %v19_v2  ;;  %v188_v8 = vpack.c.bf16 %v38_v6, %v37_v5  ;;  %v21_v9 = vld [vmem:[%s352_s1 + $0x10] sm:$0xff]  ;;  %v22_v10 = vld [vmem:[%s352_s1 + $0x18] sm:$0xff]  ;;  %v39_v11 = vld [vmem:[%s352_s1 + $0xa0] sm:$0xff] }
   0x4   :  { %185 = vmatprep.subr.bf16.mxu0 %v184_v3  ;;  %v40_v12 = vld [vmem:[%s352_s1 + $0xa8] sm:$0xff]  ;;  %v190_v13 = vpack.c.bf16 %v22_v10, %v21_v9  ;;  %v23_v15 = vld [vmem:[%s352_s1 + $0x20] sm:$0xff]  ;;  %v41_v17 = vld [vmem:[%s352_s1 + $0xb0] sm:$0xff] }
   0x5   :  { %187 = vmatpush3.bf16.msra.mxu0 %v186_v7  ;;  %v192_v14 = vpack.c.bf16 %v40_v12, %v39_v11  ;;  %v24_v16 = vld [vmem:[%s352_s1 + $0x28] sm:$0xff]  ;;  %v42_v18 = vld [vmem:[%s352_s1 + $0xb8] sm:$0xff]  ;;  %v25_v21 = vld [vmem:[%s352_s1 + $0x30] sm:$0xff] }
   0x6   :  { %189 = vmatprep.subr.bf16.mxu0 %v188_v8  ;;  %v194_v19 = vpack.c.bf16 %v24_v16, %v23_v15  ;;  %v196_v20 = vpack.c.bf16 %v42_v18, %v41_v17  ;;  %v26_v22 = vld [vmem:[%s352_s1 + $0x38] sm:$0xff]  ;;  %v43_v23 = vld [vmem:[%s352_s1 + $0xc0] sm:$0xff]  ;;  %v44_v24 = vld [vmem:[%s352_s1 + $0xc8] sm:$0xff] }
   0x7   :  { %v18_v25 = vld [vmem:[%s353_s0 + $0x8] sm:$0xff]  ;;  %v198_v26 = vpack.c.bf16 %v26_v22, %v25_v21  ;;  %v200_v27 = vpack.c.bf16 %v44_v24, %v43_v23  ;;  %v27_v28 = vld [vmem:[%s352_s1 + $0x40] sm:$0xff]  ;;  %v45_v30 = vld [vmem:[%s352_s1 + $0xd0] sm:$0xff] }
   0x8   :  { %122 = vmatprep.mubr.f32.mxu0 %v18_v25  ;;  %v28_v29 = vld [vmem:[%s352_s1 + $0x48] sm:$0xff]  ;;  %v46_v31 = vld [vmem:[%s352_s1 + $0xd8] sm:$0xff]  ;;  %v29_v34 = vld [vmem:[%s352_s1 + $0x50] sm:$0xff] }
   0x9   :  { %191 = vmatpush3.bf16.msra.mxu0 %v190_v13  ;;  %v202_v32 = vpack.c.bf16 %v28_v29, %v27_v28  ;;  %v204_v33 = vpack.c.bf16 %v46_v31, %v45_v30  ;;  %v30_v35 = vld [vmem:[%s352_s1 + $0x58] sm:$0xff]  ;;  %v47_v36 = vld [vmem:[%s352_s1 + $0xe0] sm:$0xff]  ;;  %v48_v37 = vld [vmem:[%s352_s1 + $0xe8] sm:$0xff] }
   0xa   :  { %193 = vmatprep.subr.bf16.mxu0 %v192_v14  ;;  %v206_v38 = vpack.c.bf16 %v30_v35, %v29_v34  ;;  %v208_v39 = vpack.c.bf16 %v48_v37, %v47_v36  ;;  %v31_v40 = vld [vmem:[%s352_s1 + $0x60] sm:$0xff]  ;;  %v32_v41 = vld [vmem:[%s352_s1 + $0x68] sm:$0xff]  ;;  %v49_v42 = vld [vmem:[%s352_s1 + $0xf0] sm:$0xff] }
   0xb   :  { %v50_v43 = vld [vmem:[%s352_s1 + $0xf8] sm:$0xff]  ;;  %v210_v44 = vpack.c.bf16 %v32_v41, %v31_v40  ;;  %v33_v46 = vld [vmem:[%s352_s1 + $0x70] sm:$0xff]  ;;  %v17_v49 = vld [vmem:[%s353_s0] sm:$0xff] }
   0xc   :  { %v212_v45 = vpack.c.bf16 %v50_v43, %v49_v42  ;;  %v34_v47 = vld [vmem:[%s352_s1 + $0x78] sm:$0xff]  ;;  %v147_v51 = vld [vmem:[%s354_s2] ss:$0 sm:$0xff] }
   0xd   :  { %195 = vmatpush3.bf16.msra.mxu0 %v194_v19  ;;  %v214_v48 = vpack.c.bf16 %v34_v47, %v33_v46  ;;  %v148_v55 = vld [vmem:[%s355_s3] ss:$0 sm:$0xff] }
   0xe   :  { %197 = vmatprep.subr.bf16.mxu0 %v196_v20 }
  0x11   :  { %199 = vmatpush3.bf16.msra.mxu0 %v198_v26 }
  0x12   :  { %201 = vmatprep.subr.bf16.mxu0 %v200_v27 }
  0x15   :  { %203 = vmatpush3.bf16.msra.mxu0 %v202_v32 }
  0x16   :  { %205 = vmatprep.subr.bf16.mxu0 %v204_v33 }
  0x19   :  { %207 = vmatpush3.bf16.msra.mxu0 %v206_v38 }
  0x1a   :  { %209 = vmatprep.subr.bf16.mxu0 %v208_v39 }
  0x1d   :  { %211 = vmatpush3.bf16.msra.mxu0 %v210_v44 }
  0x1e   :  { %213 = vmatprep.subr.bf16.mxu0 %v212_v45 }
  0x21   :  { %215 = vmatpush3.bf16.msra.mxu0 %v214_v48 }
  0x24   :  { %123 = vmatmul.mubr.f32.vlgmr.msra.gmra.mrb[0].mxu0 %v17_v49 }
  0xf7   :  { %v181_v50 = vpop.f32.mrb[0].mxu0 }
  0xf8   :  { %v182_v52 = vpop.f32.mrb[1].mxu0 }
  0xf9   :  { %v183_v53 = vadd.f32 %v182_v52, %v181_v50 }
  0xfb   :  { %v125_v54 = vadd.f32 %v183_v53, %v147_v51 }
  0xfd   :  { %v128_v56 = vmax.f32 %v125_v54, 0.0 }
  0xff   :  { %v136_v57 = vmul.f32 %v148_v55, %v128_v56 }
 0x101   :  { %v138_v58 = vsel %vm137_vm0, %v136_v57, 0.0 }
 0x102   :  { %139 = vadd.xlane.f32.xlu0 %v138_v58 }
 0x18f   :  { %v140_v59 = vpop.xlane.xlu0 %139 }
 0x190   :  { %142 = vst.msk [vmem:[%s356_s4] sm:$0xff] %vm141_vm1, %v140_v59 }

</bundles_post_ra>
